<compile_context>
chip_gen: v5e
topology: v5e:2x2
jax: 0.10.0
libtpu: 0.0.40
codegen_flags: <defaults>
</compile_context>

<pallas_src>
import functools

import jax
import jax.numpy as jnp
from jax.experimental import pallas as pl
from jax.experimental.pallas import tpu as pltpu


_COMPILER_PARAMS = pltpu.CompilerParams(
    # Rows are fully independent -> 'parallel' lets v7x shard the grid over both
    # TensorCores (neutral on v5e/v6e).
    dimension_semantics=("parallel",),
    # v5e's scoped-VMEM default is 16 MiB and v6e's is 32 MiB; raise it so large row
    # tiles + a resident bf16 W fit.  64 MiB stays within v7x's physical VMEM.
    vmem_limit_bytes=64 * 1024 * 1024,
)


def _pick_tm(n, desired):
    """Largest row tile <= desired that divides n (multiple of 8), else the full n."""
    if n <= desired:
        return n
    for tm in range(desired - desired % 8, 7, -8):
        if n % tm == 0:
            return tm
    return n


def _layernorm_rows(x, a2, b2, eps):
    """Torch-semantics LayerNorm on (tm, D) f32 rows: unbiased std, eps added to std."""
    d = x.shape[-1]
    mean = jnp.mean(x, axis=-1, keepdims=True)
    xc = x - mean
    var_unbiased = jnp.sum(xc * xc, axis=-1, keepdims=True) * (1.0 / (d - 1))
    std = jnp.sqrt(var_unbiased)
    # One reciprocal per row (shape (tm, 1)), then multiply -- keeps the per-element
    # VALU path free of divides.  (pl.reciprocal(approx=True) on real TPU for EUP offload.)
    inv_std = 1.0 / (std + eps)
    return a2 * (xc * inv_std) + b2


def _sublayer_kernel(*refs, eps: float, p: float):
    """out = x + dropout( LayerNorm(x) @ W + bias ).  Dropout mask comes from a
    precomputed uniform tensor u (keep iff u >= p), inverted scaling 1/(1-p)."""
    if p > 0.0:
        x_ref, a2_ref, b2_ref, w_ref, bias_ref, u_ref, o_ref = refs
    else:
        x_ref, a2_ref, b2_ref, w_ref, bias_ref, o_ref = refs
        u_ref = None

    x = x_ref[...].astype(jnp.float32)                          # (tm, D)
    normed = _layernorm_rows(x, a2_ref[...], b2_ref[...], eps)  # (tm, D) f32

    # MXU matmul: bf16 operands, f32 accumulation.
    y = jnp.dot(normed.astype(jnp.bfloat16), w_ref[...],
                preferred_element_type=jnp.float32) + bias_ref[...]

    if p > 0.0:
        keep = u_ref[...] >= p
        y = jnp.where(keep, y * (1.0 / (1.0 - p)), 0.0)

    o_ref[...] = (x + y).astype(o_ref.dtype)


def _layernorm_kernel(x_ref, a2_ref, b2_ref, o_ref, *, eps: float):
    x = x_ref[...].astype(jnp.float32)
    o_ref[...] = _layernorm_rows(x, a2_ref[...], b2_ref[...], eps).astype(o_ref.dtype)


def sublayer_connection(x, a2, b2, w, bias, *, eps=1e-6, p=0.0, dropout_u=None, tm=256):
    """x: (B, S, D).  Returns x + dropout(Linear(LayerNorm(x)))."""
    B, S, D = x.shape
    N = B * S
    xf = x.reshape(N, D)
    tm_eff = _pick_tm(N, tm)

    row_spec = pl.BlockSpec((tm_eff, D), lambda i: (i, 0))
    vec_spec = pl.BlockSpec((1, D), lambda i: (0, 0))       # invariant: fetched once
    w_spec = pl.BlockSpec((D, D), lambda i: (0, 0))         # invariant: resident bf16 W

    in_specs = [row_spec, vec_spec, vec_spec, w_spec, vec_spec]
    args = [xf,
            a2.reshape(1, D).astype(jnp.float32),
            b2.reshape(1, D).astype(jnp.float32),
            w.astype(jnp.bfloat16),                          # bf16 MXU path
            bias.reshape(1, D).astype(jnp.float32)]
    if p > 0.0:
        assert dropout_u is not None
        in_specs.append(row_spec)
        args.append(dropout_u.reshape(N, D).astype(jnp.float32))

    out = pl.pallas_call(
        functools.partial(_sublayer_kernel, eps=eps, p=p),
        out_shape=jax.ShapeDtypeStruct((N, D), x.dtype),
        grid=(N // tm_eff,),
        in_specs=in_specs,
        out_specs=row_spec,
        compiler_params=_COMPILER_PARAMS,
    )(*args)
    return out.reshape(B, S, D)


def layer_norm(x, a2, b2, *, eps=1e-6, tm=256):
    B, S, D = x.shape
    N = B * S
    tm_eff = _pick_tm(N, tm)
    row_spec = pl.BlockSpec((tm_eff, D), lambda i: (i, 0))
    vec_spec = pl.BlockSpec((1, D), lambda i: (0, 0))
    out = pl.pallas_call(
        functools.partial(_layernorm_kernel, eps=eps),
        out_shape=jax.ShapeDtypeStruct((N, D), x.dtype),
        grid=(N // tm_eff,),
        in_specs=[row_spec, vec_spec, vec_spec],
        out_specs=row_spec,
        compiler_params=_COMPILER_PARAMS,
    )(x.reshape(N, D),
      a2.reshape(1, D).astype(jnp.float32),
      b2.reshape(1, D).astype(jnp.float32))
    return out.reshape(B, S, D)


def encoder_forward(token_ids, emb_table, layer_params, norm_a2, norm_b2,
                    *, eps=1e-6, p=0.0, rng=None, tm=256):
    """Encoder.forward: embedding -> N stand-in layers -> final LayerNorm."""
    # TODO(synk): embedding gather (nn.Embedding) is a data-dependent row lookup with no
    # clean BlockSpec pattern; done in plain JAX -- the per-token hot path stays in Pallas.
    x = jnp.take(emb_table, token_ids, axis=0)               # (B, S, D)
    for (a2, b2, w, bias) in layer_params:
        u = None
        if p > 0.0:
            rng, sub = jax.random.split(rng)
            u = jax.random.uniform(sub, (x.shape[0] * x.shape[1], x.shape[2]),
                                   dtype=jnp.float32)
        x = sublayer_connection(x, a2, b2, w, bias, eps=eps, p=p, dropout_u=u, tm=tm)
    return layer_norm(x, norm_a2, norm_b2, eps=eps, tm=tm)


# ----------------------------- pure-JAX reference (p=0) -----------------------------

def _ln_ref(x, a2, b2, eps):
    d = x.shape[-1]
    mean = jnp.mean(x, axis=-1, keepdims=True)
    xc = x - mean
    std = jnp.sqrt(jnp.sum(xc * xc, axis=-1, keepdims=True) / (d - 1))
    return a2 * xc / (std + eps) + b2


def _encoder_reference(token_ids, emb_table, layer_params, norm_a2, norm_b2, eps=1e-6):
    x = jnp.take(emb_table, token_ids, axis=0)
    for a2, b2, w, bias in layer_params:
        x = x + jnp.einsum("bsd,de->bse", _ln_ref(x, a2, b2, eps), w) + bias
    return _ln_ref(x, norm_a2, norm_b2, eps)


if __name__ == "__main__":
    B, S, D, V, N_LAYERS = 2, 8, 32, 64, 2
    key = jax.random.PRNGKey(0)
    k_tok, k_emb, key = jax.random.split(key, 3)

    token_ids = jax.random.randint(k_tok, (B, S), 0, V)
    emb_table = jax.random.normal(k_emb, (V, D), dtype=jnp.float32)

    layer_params = []
    for _ in range(N_LAYERS):
        kw, kb, key = jax.random.split(key, 3)
        a2 = jnp.ones((D,), dtype=jnp.float32)    # LayerNorm a_2 init
        b2 = jnp.zeros((D,), dtype=jnp.float32)   # LayerNorm b_2 init
        w = jax.random.normal(kw, (D, D), dtype=jnp.float32) * (1.0 / jnp.sqrt(D))
        bias = jax.random.normal(kb, (D,), dtype=jnp.float32) * 0.01
        layer_params.append((a2, b2, w, bias))

    norm_a2 = jnp.ones((D,), dtype=jnp.float32)
    norm_b2 = jnp.zeros((D,), dtype=jnp.float32)

    # Eval-mode (p=0) correctness check against f32 reference (kernel matmul is bf16,
    # f32-accumulated -> loose tolerance).
    out_eval = encoder_forward(token_ids, emb_table, layer_params, norm_a2, norm_b2, p=0.0)
    jax.block_until_ready(out_eval)
    ref = _encoder_reference(token_ids, emb_table, layer_params, norm_a2, norm_b2)
    assert jnp.allclose(out_eval, ref, atol=2e-2, rtol=2e-2), "mismatch vs reference"

    # Training-mode run with dropout p=0.1 (mask from precomputed uniforms).
    # TODO(synk): torch's dropout bit-pattern is RNG-implementation specific and is not
    # reproduced; only the keep-probability / inverted-scaling semantics are matched.
    out_train = encoder_forward(token_ids, emb_table, layer_params, norm_a2, norm_b2,
                                p=0.1, rng=jax.random.PRNGKey(42))
    jax.block_until_ready(out_train)

    print("KERNEL_OK")
</pallas_src>

<mosaic_0001>
module attributes {stable_mosaic.version = 11 : i64} {
  func.func @_sublayer_kernel(%arg0: i32, %arg1: memref<16x32xf32, #tpu.memory_space<vmem>>, %arg2: memref<1x32xf32, #tpu.memory_space<vmem>>, %arg3: memref<1x32xf32, #tpu.memory_space<vmem>>, %arg4: memref<32x32xbf16, #tpu.memory_space<vmem>>, %arg5: memref<1x32xf32, #tpu.memory_space<vmem>>, %arg6: memref<16x32xf32, #tpu.memory_space<vmem>>) attributes {dimension_semantics = [#tpu.dimension_semantics<parallel>], iteration_bounds = array<i64: 1>, scalar_prefetch = 0 : i64, scratch_operands = 0 : i64, tpu.core_type = #tpu.core_type<tc>, window_params = [{transform_indices = @transform_0, window_bounds = array<i64: 16, 32>}, {pipeline_mode = #tpu.pipeline_mode<synchronous>, transform_indices = @transform_1, window_bounds = array<i64: 1, 32>}, {pipeline_mode = #tpu.pipeline_mode<synchronous>, transform_indices = @transform_2, window_bounds = array<i64: 1, 32>}, {pipeline_mode = #tpu.pipeline_mode<synchronous>, transform_indices = @transform_3, window_bounds = array<i64: 32, 32>}, {pipeline_mode = #tpu.pipeline_mode<synchronous>, transform_indices = @transform_4, window_bounds = array<i64: 1, 32>}, {transform_indices = @transform_5, window_bounds = array<i64: 16, 32>}]} {
    %c0 = arith.constant 0 : index
    %c0_0 = arith.constant 0 : index
    %0 = vector.load %arg1[%c0, %c0_0] : memref<16x32xf32, #tpu.memory_space<vmem>>, vector<16x32xf32>
    %c0_1 = arith.constant 0 : index
    %c0_2 = arith.constant 0 : index
    %1 = vector.load %arg2[%c0_1, %c0_2] : memref<1x32xf32, #tpu.memory_space<vmem>>, vector<1x32xf32>
    %c0_3 = arith.constant 0 : index
    %c0_4 = arith.constant 0 : index
    %2 = vector.load %arg3[%c0_3, %c0_4] : memref<1x32xf32, #tpu.memory_space<vmem>>, vector<1x32xf32>
    %cst = arith.constant dense<0.000000e+00> : vector<16xf32>
    %3 = vector.multi_reduction <add>, %0, %cst [1] : vector<16x32xf32> to vector<16xf32>
    %4 = vector.shape_cast %3 : vector<16xf32> to vector<16x1xf32>
    %cst_5 = arith.constant 3.200000e+01 : f32
    %5 = vector.broadcast %cst_5 : f32 to vector<16x1xf32>
    %6 = arith.divf %4, %5 : vector<16x1xf32>
    %7 = vector.broadcast %6 : vector<16x1xf32> to vector<16x32xf32>
    %8 = arith.subf %0, %7 : vector<16x32xf32>
    %9 = arith.mulf %8, %8 : vector<16x32xf32>
    %cst_6 = arith.constant dense<0.000000e+00> : vector<16xf32>
    %10 = vector.multi_reduction <add>, %9, %cst_6 [1] : vector<16x32xf32> to vector<16xf32>
    %11 = vector.shape_cast %10 : vector<16xf32> to vector<16x1xf32>
    %cst_7 = arith.constant 0.0322580636 : f32
    %12 = vector.broadcast %cst_7 : f32 to vector<16x1xf32>
    %13 = arith.mulf %11, %12 : vector<16x1xf32>
    %14 = math.sqrt %13 : vector<16x1xf32>
    %cst_8 = arith.constant 9.99999997E-7 : f32
    %15 = vector.broadcast %cst_8 : f32 to vector<16x1xf32>
    %16 = arith.addf %14, %15 : vector<16x1xf32>
    %cst_9 = arith.constant 1.000000e+00 : f32
    %17 = vector.broadcast %cst_9 : f32 to vector<16x1xf32>
    %18 = arith.divf %17, %16 : vector<16x1xf32>
    %19 = vector.broadcast %18 : vector<16x1xf32> to vector<16x32xf32>
    %20 = arith.mulf %8, %19 : vector<16x32xf32>
    %21 = vector.broadcast %1 : vector<1x32xf32> to vector<16x32xf32>
    %22 = arith.mulf %21, %20 : vector<16x32xf32>
    %23 = vector.broadcast %2 : vector<1x32xf32> to vector<16x32xf32>
    %24 = arith.addf %22, %23 : vector<16x32xf32>
    %25 = arith.truncf %24 : vector<16x32xf32> to vector<16x32xbf16>
    %c0_10 = arith.constant 0 : index
    %c0_11 = arith.constant 0 : index
    %26 = vector.load %arg4[%c0_10, %c0_11] : memref<32x32xbf16, #tpu.memory_space<vmem>>, vector<32x32xbf16>
    %cst_12 = arith.constant dense<0.000000e+00> : vector<16x32xf32>
    %27 = tpu.matmul %25, %26, %cst_12 {dimension_numbers = #tpu.dot_dimension_numbers<[1], [0], [0], [1], [0, 0, 1, 1], [], []>} : vector<16x32xbf16>, vector<32x32xbf16>, vector<16x32xf32> -> vector<16x32xf32>
    %c0_13 = arith.constant 0 : index
    %c0_14 = arith.constant 0 : index
    %28 = vector.load %arg5[%c0_13, %c0_14] : memref<1x32xf32, #tpu.memory_space<vmem>>, vector<1x32xf32>
    %29 = vector.broadcast %28 : vector<1x32xf32> to vector<16x32xf32>
    %30 = arith.addf %27, %29 : vector<16x32xf32>
    %31 = arith.addf %0, %30 : vector<16x32xf32>
    %c0_15 = arith.constant 0 : index
    %c0_16 = arith.constant 0 : index
    %32 = vector.load %arg6[%c0_15, %c0_16] : memref<16x32xf32, #tpu.memory_space<vmem>>, vector<16x32xf32>
    tpu.vector_store %arg6[%c0_15, %c0_16], %31 {strides = array<i32>} : memref<16x32xf32, #tpu.memory_space<vmem>>, vector<16x32xf32>,
    return
  }
  func.func @transform_0(%arg0: i32) -> (i32, i32) {
    %c0_i32 = arith.constant 0 : i32
    %c0_i32_0 = arith.constant 0 : i32
    return %arg0, %c0_i32 : i32, i32
  }
  func.func @transform_1(%arg0: i32) -> (i32, i32) {
    %c0_i32 = arith.constant 0 : i32
    %c0_i32_0 = arith.constant 0 : i32
    %c0_i32_1 = arith.constant 0 : i32
    return %c0_i32, %c0_i32_0 : i32, i32
  }
  func.func @transform_2(%arg0: i32) -> (i32, i32) {
    %c0_i32 = arith.constant 0 : i32
    %c0_i32_0 = arith.constant 0 : i32
    %c0_i32_1 = arith.constant 0 : i32
    return %c0_i32, %c0_i32_0 : i32, i32
  }
  func.func @transform_3(%arg0: i32) -> (i32, i32) {
    %c0_i32 = arith.constant 0 : i32
    %c0_i32_0 = arith.constant 0 : i32
    %c0_i32_1 = arith.constant 0 : i32
    return %c0_i32, %c0_i32_0 : i32, i32
  }
  func.func @transform_4(%arg0: i32) -> (i32, i32) {
    %c0_i32 = arith.constant 0 : i32
    %c0_i32_0 = arith.constant 0 : i32
    %c0_i32_1 = arith.constant 0 : i32
    return %c0_i32, %c0_i32_0 : i32, i32
  }
  func.func @transform_5(%arg0: i32) -> (i32, i32) {
    %c0_i32 = arith.constant 0 : i32
    %c0_i32_0 = arith.constant 0 : i32
    return %arg0, %c0_i32 : i32, i32
  }
}

</mosaic_0001>

<bundles_post_ra>
// kernel: tpu_custom_call.1
= control target key start
LH: loop header
LB: loop body
LE: loop exit
PB: predicated region body
PF: predicated region fallthrough
CT: control target
= control target key end

     0   :  { %10 = vsyncpa [#allocation3], 0  ;;  %s454_s0 = inlined_call_operand.hbm [shape: f32[16,32], index: 0, kind: input, shape index: {}]   ;;  %s455_s1 = inlined_call_operand.hbm [shape: f32[1,32], index: 1, kind: input, shape index: {}]   ;;  %s456_s2 = inlined_call_operand.vmem [shape: f32[1,32], index: 2, kind: input, shape index: {}]   ;;  %s457_s3 = inlined_call_operand.hbm [shape: bf16[32,32], index: 3, kind: input, shape index: {}]   ;;  %s458_s4 = inlined_call_operand.vmem [shape: f32[1,32], index: 4, kind: input, shape index: {}]   ;;  %s459_s5 = inlined_call_operand.hbm [shape: f32[16,32], index: 5, kind: output, shape index: {}]  }
   0x1   :  { %11 = vsyncpa [#allocation6], 0  ;;  %s31_s20 = sshll.u32 %s455_s1, 4  ;;  %s32_s20 = int_to_ptr.hbm [resolvable:$true] %s31_s20 }
   0x2   :  { %12 = vsyncpa [#allocation4], 0  ;;  %s364_s21 = smov [#allocation5]   ;;  %s17_s25 = sshll.u32 %s454_s0, 4  ;;  %s18_s25 = int_to_ptr.hbm [resolvable:$true] %s17_s25 }
   0x3   :  { %s33_s22 = sshll.u32 %s364_s21, 4  ;;  %s365_s26 = smov [#allocation2]   ;;  %s34_s22 = int_to_ptr.vmem [resolvable:$true] %s33_s22 }
   0x4   :  { %36 = dma.hbm_to_vmem [thread:$0]  %s32_s20, 16, %s34_s22, [#allocation6]  }
   0x5   :  { %s19_s27 = sshll.u32 %s365_s26, 4  ;;  %s366_s28 = smov 128   ;;  %s20_s27 = int_to_ptr.vmem [resolvable:$true] %s19_s27 }
   0x6   :  { %s367_s29 = smov 8   ;;  %s43_s6 = sshll.u32 %s457_s3, 4  ;;  %s44_s6 = int_to_ptr.hbm [resolvable:$true] %s43_s6 }
   0x7   :  { %25 = dma.hbm_to_vmem [thread:$0]  %s18_s25, 256, %s20_s27, [#allocation3], %s366_s28, %s366_s28, %s367_s29  }
   0x8   :  { %s368_s7 = smov [#allocation7]   ;;  %s369_s0 = smov 64  }
   0x9   :  { %s45_s8 = sshll.u32 %s368_s7, 4  ;;  %s370_s9 = smov 4   ;;  %s46_s8 = int_to_ptr.vmem [resolvable:$true] %s45_s8 }
   0xa   :  { %51 = dma.hbm_to_vmem [thread:$0]  %s44_s6, 256, %s46_s8, [#allocation6], %s369_s0, %s369_s0, %s370_s9  }
   0xb   :  { %358 = dma.done.wait [#allocation3], 256  }
   0xc   :  { %359 = vsyncadd [#allocation3], 4294967040 }
   0xd   :  { %360 = dma.done.wait [#allocation6], 272  }
   0xe   :  { %361 = vsyncadd [#allocation6], 4294967024  ;;  %vm71_vm0 = vcmask 261120   ;;  %v415_v0 = vld [vmem:[#allocation2] sm:$0xff]  ;;  %v419_v2 = vld [vmem:[#allocation2 + $0x8] sm:$0xff]  ;;  %v371_v4 = vmov 32.0  }
   0xf   :  { %v72_v1 = vsel %vm71_vm0, %v415_v0, 0.0  ;;  %v75_v3 = vsel %vm71_vm0, %v419_v2, 0.0  ;;  %252 = vrcp.f32 %v371_v4  ;;  %v239_v21 = vld [vmem:[#allocation7 + $0x8] sm:$0xff]  ;;  %v238_v23 = vld [vmem:[#allocation7] sm:$0xff]  ;;  %s372_s13 = smov [#allocation8]   ;;  %s215_s16 = sshll.u32 %s459_s5, 4  ;;  %s216_s16 = int_to_ptr.hbm [resolvable:$true] %s215_s16 }
  0x10   :  { %73 = vadd.xlane.f32.xlu0 %v72_v1  ;;  %197 = vmatpush.bf16.msra.mxu0 %v239_v21  ;;  %s213_s14 = sshll.u32 %s372_s13, 4  ;;  %s214_s14 = int_to_ptr.vmem [resolvable:$true] %s213_s14 }
  0x14   :  { %198 = vmatpush.bf16.msra.mxu0 %v238_v23 }
  0x15   :  { %v253_v5 = vpop.eup %252 }
  0x16   :  { %v79_v6 = vmul.f32 32.0, %v253_v5  ;;  %vm83_vm1 = vweird.f32 %v253_v5 }
  0x18   :  { %76 = vadd.xlane.f32.xlu0 %v75_v3  ;;  %v80_v7 = vsub.f32 1.0, %v79_v6 }
  0x1a   :  { %v81_v8 = vmul.f32 %v253_v5, %v80_v7 }
  0x1c   :  { %v82_v9 = vadd.f32 %v253_v5, %v81_v8 }
  0x1e   :  { %v84_v10 = vsel %vm83_vm1, %v253_v5, %v82_v9  ;;  %v249_v5 = vld [vmem:[#allocation5] ss:$0 sm:$0xff] }
  0x83   :  { %v74_v11 = vpop.xlane.xlu0 %73 }
  0x84   :  { %v85_v12 = vmul.f32 %v84_v10, %v74_v11  ;;  %v250_v11 = vld [vmem:[%s456_s2] ss:$0 sm:$0xff] }
  0x86   :  { %v424_v13 = vsub.f32 %v415_v0, %v85_v12 }
  0x88   :  { %v89_v14 = vmul.f32 %v424_v13, %v424_v13 }
  0x8a   :  { %v91_v15 = vsel %vm71_vm0, %v89_v14, 0.0 }
  0x8b   :  { %92 = vadd.xlane.f32.xlu1 %v91_v15  ;;  %v77_v16 = vpop.xlane.xlu0 %76 }
  0x8c   :  { %v86_v17 = vmul.f32 %v84_v10, %v77_v16 }
  0x8e   :  { %v430_v18 = vsub.f32 %v419_v2, %v86_v17 }
  0x90   :  { %v90_v19 = vmul.f32 %v430_v18, %v430_v18 }
  0x92   :  { %v94_v20 = vsel %vm71_vm0, %v90_v19, 0.0 }
  0x93   :  { %95 = vadd.xlane.f32.xlu1 %v94_v20 }
  0xfe   :  { %v93_v22 = vpop.xlane.xlu1 %92 }
  0xff   :  { %v97_v24 = vmul.f32 0.032258064, %v93_v22 }
 0x101   :  { %254 = vrsqrt.f32 %v97_v24  ;;  %vm106_vm2 = vcmp.eq.f32.partialorder %v97_v24, inf  ;;  %v109_v37 = vand.u32 2147483648, %v97_v24  ;;  %vm108_vm3 = vcmp.eq.f32.partialorder %v97_v24, 0.0 }
 0x106   :  { %v96_v25 = vpop.xlane.xlu1 %95 }
 0x107   :  { %v255_v26 = vpop.eup %254  ;;  %v98_v27 = vmul.f32 0.032258064, %v96_v25 }
 0x108   :  { %v100_v28 = vmul.f32 %v255_v26, %v97_v24 }
 0x109   :  { %256 = vrsqrt.f32 %v98_v27  ;;  %vm118_vm4 = vcmp.eq.f32.partialorder %v98_v27, inf  ;;  %v121_v45 = vand.u32 2147483648, %v98_v27  ;;  %vm120_vm5 = vcmp.eq.f32.partialorder %v98_v27, 0.0 }
 0x10a   :  { %v101_v29 = vmul.f32 %v255_v26, %v100_v28 }
 0x10c   :  { %v102_v30 = vmul.f32 0.5, %v101_v29 }
 0x10e   :  { %v103_v31 = vsub.f32 1.5, %v102_v30 }
 0x10f   :  { %v257_v32 = vpop.eup %256 }
 0x110   :  { %v104_v33 = vmul.f32 %v255_v26, %v103_v31  ;;  %v112_v34 = vmul.f32 %v257_v32, %v98_v27 }
 0x112   :  { %v105_v35 = vmul.f32 %v104_v33, %v97_v24  ;;  %v113_v36 = vmul.f32 %v257_v32, %v112_v34 }
 0x114   :  { %v107_v38 = vsel %vm106_vm2, %v97_v24, %v105_v35  ;;  %v114_v39 = vmul.f32 0.5, %v113_v36 }
 0x115   :  { %v110_v40 = vsel %vm108_vm3, %v109_v37, %v107_v38 }
 0x116   :  { %v115_v41 = vsub.f32 1.5, %v114_v39  ;;  %v123_v42 = vadd.f32 1e-06, %v110_v40 }
 0x118   :  { %v116_v43 = vmul.f32 %v257_v32, %v115_v41  ;;  %258 = vrcp.f32 %v123_v42  ;;  %v136_v53 = vand.u32 2147483648, %v123_v42  ;;  %vm130_vm7 = vweird.f32 %v123_v42 }
 0x119   :  { %v134_v55 = vand.u32 2147483647, %v123_v42 }
 0x11a   :  { %v117_v44 = vmul.f32 %v116_v43, %v98_v27  ;;  %v137_v59 = vor.u32 1.1754944e-38, %v136_v53 }
 0x11b   :  { %vm135_vm9 = vcmp.eq.f32.partialorder %v134_v55, 8.507059e+37 }
 0x11c   :  { %v119_v46 = vsel %vm118_vm4, %v98_v27, %v117_v44 }
 0x11d   :  { %v122_v47 = vsel %vm120_vm5, %v121_v45, %v119_v46 }
 0x11e   :  { %v259_v48 = vpop.eup %258  ;;  %v124_v49 = vadd.f32 1e-06, %v122_v47 }
 0x11f   :  { %v126_v50 = vmul.f32 %v259_v48, %v123_v42  ;;  %vm131_vm6 = vweird.f32 %v259_v48 }
 0x120   :  { %260 = vrcp.f32 %v124_v49  ;;  %vm132_vm8 = vmor %vm130_vm7, %vm131_vm6  ;;  %v151_v62 = vand.u32 2147483648, %v124_v49  ;;  %v149_v1 = vand.u32 2147483647, %v124_v49  ;;  %vm145_vm11 = vweird.f32 %v124_v49 }
 0x121   :  { %v127_v51 = vsub.f32 1.0, %v126_v50 }
 0x122   :  { %v152_v6 = vor.u32 1.1754944e-38, %v151_v62  ;;  %vm150_vm13 = vcmp.eq.f32.partialorder %v149_v1, 8.507059e+37 }
 0x123   :  { %v128_v52 = vmul.f32 %v259_v48, %v127_v51 }
 0x125   :  { %v129_v54 = vadd.f32 %v259_v48, %v128_v52 }
 0x126   :  { %v261_v56 = vpop.eup %260 }
 0x127   :  { %v133_v57 = vsel %vm132_vm8, %v259_v48, %v129_v54  ;;  %v141_v58 = vmul.f32 %v261_v56, %v124_v49  ;;  %vm146_vm10 = vweird.f32 %v261_v56 }
 0x128   :  { %v138_v61 = vsel %vm135_vm9, %v137_v59, %v133_v57  ;;  %vm147_vm12 = vmor %vm145_vm11, %vm146_vm10 }
 0x129   :  { %v142_v60 = vsub.f32 1.0, %v141_v58  ;;  %v155_v4 = vmul.f32 %v138_v61, %v424_v13  ;;  %v251_v13 = vld [vmem:[%s458_s4] ss:$0 sm:$0xff] }
 0x12b   :  { %v143_v63 = vmul.f32 %v261_v56, %v142_v60  ;;  %v160_v10 = vmul.f32 %v249_v5, %v155_v4 }
 0x12d   :  { %v144_v3 = vadd.f32 %v261_v56, %v143_v63  ;;  %v165_v14 = vadd.f32 %v250_v11, %v160_v10 }
 0x12f   :  { %v148_v7 = vsel %vm147_vm12, %v261_v56, %v144_v3 }
 0x130   :  { %v153_v8 = vsel %vm150_vm13, %v152_v6, %v148_v7 }
 0x131   :  { %v156_v9 = vmul.f32 %v153_v8, %v430_v18 }
 0x133   :  { %v161_v12 = vmul.f32 %v249_v5, %v156_v9 }
 0x135   :  { %v166_v15 = vadd.f32 %v250_v11, %v161_v12 }
 0x137   :  { %v167_v16 = vpack.c.bf16 %v166_v15, %v165_v14 }
 0x139   :  { %237 = vmatmul.msk.bf16.vlgmr.msra.gmra.mxu0 %vm71_vm0, %v167_v16 }
 0x1b6   :  { %v200_v17 = vpop.f32.mrf.mxu0 }
 0x1b7   :  { %v201_v19 = vadd.f32 %v251_v13, %v200_v17 }
 0x1b9   :  { %v205_v20 = vadd.f32 %v201_v19, %v415_v0 }
 0x1bb   :  { %207 = vst.msk [vmem:[#allocation8] sm:$0xff] %vm71_vm0, %v205_v20 }
 0x1be   :  { %v202_v18 = vpop.f32.mrf.mxu0 }
 0x1bf   :  { %v203_v21 = vadd.f32 %v251_v13, %v202_v18 }
 0x1c1   :  { %v206_v22 = vadd.f32 %v203_v21, %v419_v2 }
 0x1c3   :  { %208 = vst.msk [vmem:[#allocation8 + $0x8] sm:$0xff] %vm71_vm0, %v206_v22 }
 0x1c4   :  { %221 = dma.vmem_to_hbm [thread:$0]  %s214_s14, 256, %s216_s16, [#allocation4], %s366_s28, %s366_s28, %s367_s29  }
 0x1c5   :  { %362 = dma.done.wait [#allocation4], 256  }
 0x1c6   :  { %363 = vsyncadd [#allocation4], 4294967040 }
 0x1c7   :  { %226 = vsyncpa [#allocation3], 1 }
 0x1c8   :  { %227 = vsyncpa [#allocation6], 1 }
 0x1c9   :  { %228 = vsyncpa [#allocation4], 1 }

</bundles_post_ra>
